<compile_context>
chip_gen: v5e
topology: v5e:2x2
jax: 0.10.0
libtpu: 0.0.40
codegen_flags: <defaults>
</compile_context>

<pallas_src>
import functools

import jax
import jax.numpy as jnp
from jax.experimental import pallas as pl
from jax.experimental.pallas import tpu as pltpu


def _round_up(x, m):
    return ((x + m - 1) // m) * m


def _actor_kernel(ob_ref, w1_ref, b1_ref, w2_ref, b2_ref, w3_ref, b3_ref,
                  out_ref, *, use_tanh):
    # One batch tile per grid step: DMA ob tile -> 3 MXU matmuls -> DMA out tile.
    # Weights/biases are resident (constant block index across the grid).
    x = ob_ref[...]                                                  # [TB, OBp]

    h1 = jnp.dot(x, w1_ref[...], preferred_element_type=jnp.float32) + b1_ref[...]
    h1 = jnp.maximum(h1, 0.0)                                        # relu (f32)

    h2 = jnp.dot(h1.astype(w2_ref.dtype), w2_ref[...],
                 preferred_element_type=jnp.float32) + b2_ref[...]
    h2 = jnp.maximum(h2, 0.0)                                        # relu (f32)

    y = jnp.dot(h2.astype(w3_ref.dtype), w3_ref[...],
                preferred_element_type=jnp.float32) + b3_ref[...]
    # max_action is pre-folded into w3/b3 by the wrapper.
    if use_tanh:
        y = jnp.tanh(y)
    out_ref[...] = y.astype(out_ref.dtype)


def actor_forward(ob, params, *, max_action=1.0, use_tanh=False,
                  compute_dtype=jnp.bfloat16, block_b=256):
    """params = (W1, b1, W2, b2, W3, b3); Wk: [in, out], bk: [1, out]."""
    w1, b1, w2, b2, w3, b3 = params
    B, size_ob = ob.shape
    h1 = w1.shape[1]
    h2 = w2.shape[1]
    size_action = w3.shape[1]

    # Fold max_action into the last layer (valid for both branches:
    # tanh((h@W3 + b3)*a) == tanh(h@(a*W3) + a*b3)).
    ma = jnp.asarray(max_action, jnp.float32)
    w3 = w3 * ma
    b3 = b3 * ma

    # Lane-dense padding of every feature dim to a multiple of 128.
    # Zero padding preserves semantics: relu(0 + 0) = 0 feeds zero weight rows
    # downstream, and padded output columns are sliced off below.
    OBp = _round_up(size_ob, 128)
    H1p = _round_up(h1, 128)
    H2p = _round_up(h2, 128)
    Ap = _round_up(size_action, 128)

    # Batch tile: big enough for pipelining, never larger than the padded batch.
    TB = max(8, min(int(block_b), _round_up(B, 8)))
    Bp = _round_up(B, TB)

    def pad2(a, rows, cols):
        return jnp.pad(a, ((0, rows - a.shape[0]), (0, cols - a.shape[1])))

    cd = jnp.dtype(compute_dtype)
    ob_p = pad2(ob.astype(jnp.float32), Bp, OBp).astype(cd)   # MXU input dtype
    w1_p = pad2(w1, OBp, H1p).astype(cd)
    w2_p = pad2(w2, H1p, H2p).astype(cd)
    w3_p = pad2(w3, H2p, Ap).astype(cd)
    b1_p = pad2(b1, 1, H1p).astype(jnp.float32)               # f32 elementwise
    b2_p = pad2(b2, 1, H2p).astype(jnp.float32)
    b3_p = pad2(b3, 1, Ap).astype(jnp.float32)

    kernel = functools.partial(_actor_kernel, use_tanh=bool(use_tanh))

    flops = 2 * Bp * (OBp * H1p + H1p * H2p + H2p * Ap)
    bytes_accessed = int(
        ob_p.size * cd.itemsize
        + (w1_p.size + w2_p.size + w3_p.size) * cd.itemsize
        + (b1_p.size + b2_p.size + b3_p.size) * 4
        + Bp * Ap * 4)
    cost = pl.CostEstimate(
        flops=flops,
        transcendentals=(Bp * Ap if use_tanh else 0),
        bytes_accessed=bytes_accessed)

    def resident(a):
        nd = a.ndim
        return pl.BlockSpec(a.shape, lambda i, _nd=nd: (0,) * _nd)

    out_p = pl.pallas_call(
        kernel,
        out_shape=jax.ShapeDtypeStruct((Bp, Ap), jnp.float32),
        grid=(Bp // TB,),
        in_specs=[pl.BlockSpec((TB, OBp), lambda i: (i, 0)),   # ob: tiled on batch
                  resident(w1_p), resident(b1_p),
                  resident(w2_p), resident(b2_p),
                  resident(w3_p), resident(b3_p)],
        out_specs=pl.BlockSpec((TB, Ap), lambda i: (i, 0)),
        compiler_params=pltpu.CompilerParams(
            dimension_semantics=("parallel",)),                # v7x: 2 TCs
        cost_estimate=cost,
    )(ob_p, w1_p, b1_p, w2_p, b2_p, w3_p, b3_p)

    return out_p[:B, :size_action]


def init_actor_params(key, size_ob, size_action, hidden1, hidden2):
    """Deterministic synthetic parameters (shapes match nn.Linear layers)."""
    ks = jax.random.split(key, 6)

    def linear(kw, kb, fan_in, fan_out):
        bound = 1.0 / jnp.sqrt(fan_in)
        w = jax.random.uniform(kw, (fan_in, fan_out), jnp.float32, -bound, bound)
        b = jax.random.uniform(kb, (1, fan_out), jnp.float32, -bound, bound)
        return w, b

    w1, b1 = linear(ks[0], ks[1], size_ob, hidden1)      # self.inp
    w2, b2 = linear(ks[2], ks[3], hidden1, hidden2)      # self.int
    w3, b3 = linear(ks[4], ks[5], hidden2, size_action)  # self.out
    return (w1, b1, w2, b2, w3, b3)


def _reference(ob, params, max_action, use_tanh):
    w1, b1, w2, b2, w3, b3 = params
    h = jnp.maximum(ob @ w1 + b1, 0.0)
    h = jnp.maximum(h @ w2 + b2, 0.0)
    y = (h @ w3 + b3) * max_action
    return jnp.tanh(y) if use_tanh else y


if __name__ == "__main__":
    # Small shapes consistent with the module's forward.
    B, SIZE_OB, H1, H2, SIZE_ACTION = 8, 16, 32, 32, 8
    MAX_ACTION = 2.0

    key = jax.random.PRNGKey(0)
    k_ob, k_params, k_ob2 = jax.random.split(key, 3)
    ob = jax.random.normal(k_ob, (B, SIZE_OB), jnp.float32)
    params = init_actor_params(k_params, SIZE_OB, SIZE_ACTION, H1, H2)

    # 1) f32 MXU inputs, both branches (tanh=False / tanh=True) -- strict check.
    y_lin = actor_forward(ob, params, max_action=MAX_ACTION, use_tanh=False,
                          compute_dtype=jnp.float32)
    y_tanh = actor_forward(ob, params, max_action=MAX_ACTION, use_tanh=True,
                           compute_dtype=jnp.float32)
    jax.block_until_ready((y_lin, y_tanh))
    assert jnp.allclose(y_lin, _reference(ob, params, MAX_ACTION, False),
                        atol=1e-4, rtol=1e-4)
    assert jnp.allclose(y_tanh, _reference(ob, params, MAX_ACTION, True),
                        atol=1e-4, rtol=1e-4)

    # 2) Default bf16 MXU path on a larger, non-aligned batch to exercise the
    #    batch grid + padding (looser tolerance for bf16 inputs).
    B2 = 300
    ob2 = jax.random.normal(k_ob2, (B2, SIZE_OB), jnp.float32)
    y_bf16 = actor_forward(ob2, params, max_action=MAX_ACTION, use_tanh=True)
    jax.block_until_ready(y_bf16)
    assert jnp.allclose(y_bf16, _reference(ob2, params, MAX_ACTION, True),
                        atol=3e-2, rtol=3e-2)

    print("KERNEL_OK")
</pallas_src>

<mosaic_0001>
module attributes {stable_mosaic.version = 11 : i64} {
  func.func @_actor_kernel(%arg0: i32, %arg1: memref<8x128xf32, #tpu.memory_space<vmem>>, %arg2: memref<128x128xf32, #tpu.memory_space<vmem>>, %arg3: memref<1x128xf32, #tpu.memory_space<vmem>>, %arg4: memref<128x128xf32, #tpu.memory_space<vmem>>, %arg5: memref<1x128xf32, #tpu.memory_space<vmem>>, %arg6: memref<128x128xf32, #tpu.memory_space<vmem>>, %arg7: memref<1x128xf32, #tpu.memory_space<vmem>>, %arg8: memref<8x128xf32, #tpu.memory_space<vmem>>) attributes {dimension_semantics = [#tpu.dimension_semantics<parallel>], iteration_bounds = array<i64: 1>, scalar_prefetch = 0 : i64, scratch_operands = 0 : i64, tpu.core_type = #tpu.core_type<tc>, window_params = [{transform_indices = @transform_0, window_bounds = array<i64: 8, 128>}, {pipeline_mode = #tpu.pipeline_mode<synchronous>, transform_indices = @transform_1, window_bounds = array<i64: 128, 128>}, {pipeline_mode = #tpu.pipeline_mode<synchronous>, transform_indices = @transform_2, window_bounds = array<i64: 1, 128>}, {pipeline_mode = #tpu.pipeline_mode<synchronous>, transform_indices = @transform_3, window_bounds = array<i64: 128, 128>}, {pipeline_mode = #tpu.pipeline_mode<synchronous>, transform_indices = @transform_4, window_bounds = array<i64: 1, 128>}, {pipeline_mode = #tpu.pipeline_mode<synchronous>, transform_indices = @transform_5, window_bounds = array<i64: 128, 128>}, {pipeline_mode = #tpu.pipeline_mode<synchronous>, transform_indices = @transform_6, window_bounds = array<i64: 1, 128>}, {transform_indices = @transform_7, window_bounds = array<i64: 8, 128>}]} {
    %c0 = arith.constant 0 : index
    %c0_0 = arith.constant 0 : index
    %0 = vector.load %arg1[%c0, %c0_0] : memref<8x128xf32, #tpu.memory_space<vmem>>, vector<8x128xf32>
    %c0_1 = arith.constant 0 : index
    %c0_2 = arith.constant 0 : index
    %1 = vector.load %arg2[%c0_1, %c0_2] : memref<128x128xf32, #tpu.memory_space<vmem>>, vector<128x128xf32>
    %cst = arith.constant dense<0.000000e+00> : vector<8x128xf32>
    %2 = tpu.matmul %0, %1, %cst {dimension_numbers = #tpu.dot_dimension_numbers<[1], [0], [0], [1], [0, 0, 1, 1], [], []>} : vector<8x128xf32>, vector<128x128xf32>, vector<8x128xf32> -> vector<8x128xf32>
    %c0_3 = arith.constant 0 : index
    %c0_4 = arith.constant 0 : index
    %3 = vector.load %arg3[%c0_3, %c0_4] : memref<1x128xf32, #tpu.memory_space<vmem>>, vector<1x128xf32>
    %4 = vector.broadcast %3 : vector<1x128xf32> to vector<8x128xf32>
    %5 = arith.addf %2, %4 : vector<8x128xf32>
    %cst_5 = arith.constant 0.000000e+00 : f32
    %6 = vector.broadcast %cst_5 : f32 to vector<8x128xf32>
    %7 = arith.maximumf %5, %6 : vector<8x128xf32>
    %c0_6 = arith.constant 0 : index
    %c0_7 = arith.constant 0 : index
    %8 = vector.load %arg4[%c0_6, %c0_7] : memref<128x128xf32, #tpu.memory_space<vmem>>, vector<128x128xf32>
    %cst_8 = arith.constant dense<0.000000e+00> : vector<8x128xf32>
    %9 = tpu.matmul %7, %8, %cst_8 {dimension_numbers = #tpu.dot_dimension_numbers<[1], [0], [0], [1], [0, 0, 1, 1], [], []>} : vector<8x128xf32>, vector<128x128xf32>, vector<8x128xf32> -> vector<8x128xf32>
    %c0_9 = arith.constant 0 : index
    %c0_10 = arith.constant 0 : index
    %10 = vector.load %arg5[%c0_9, %c0_10] : memref<1x128xf32, #tpu.memory_space<vmem>>, vector<1x128xf32>
    %11 = vector.broadcast %10 : vector<1x128xf32> to vector<8x128xf32>
    %12 = arith.addf %9, %11 : vector<8x128xf32>
    %cst_11 = arith.constant 0.000000e+00 : f32
    %13 = vector.broadcast %cst_11 : f32 to vector<8x128xf32>
    %14 = arith.maximumf %12, %13 : vector<8x128xf32>
    %c0_12 = arith.constant 0 : index
    %c0_13 = arith.constant 0 : index
    %15 = vector.load %arg6[%c0_12, %c0_13] : memref<128x128xf32, #tpu.memory_space<vmem>>, vector<128x128xf32>
    %cst_14 = arith.constant dense<0.000000e+00> : vector<8x128xf32>
    %16 = tpu.matmul %14, %15, %cst_14 {dimension_numbers = #tpu.dot_dimension_numbers<[1], [0], [0], [1], [0, 0, 1, 1], [], []>} : vector<8x128xf32>, vector<128x128xf32>, vector<8x128xf32> -> vector<8x128xf32>
    %c0_15 = arith.constant 0 : index
    %c0_16 = arith.constant 0 : index
    %17 = vector.load %arg7[%c0_15, %c0_16] : memref<1x128xf32, #tpu.memory_space<vmem>>, vector<1x128xf32>
    %18 = vector.broadcast %17 : vector<1x128xf32> to vector<8x128xf32>
    %19 = arith.addf %16, %18 : vector<8x128xf32>
    %c0_17 = arith.constant 0 : index
    %c0_18 = arith.constant 0 : index
    %20 = vector.load %arg8[%c0_17, %c0_18] : memref<8x128xf32, #tpu.memory_space<vmem>>, vector<8x128xf32>
    tpu.vector_store %arg8[%c0_17, %c0_18], %19 {strides = array<i32>} : memref<8x128xf32, #tpu.memory_space<vmem>>, vector<8x128xf32>,
    return
  }
  func.func @transform_0(%arg0: i32) -> (i32, i32) {
    %c0_i32 = arith.constant 0 : i32
    %c0_i32_0 = arith.constant 0 : i32
    return %arg0, %c0_i32 : i32, i32
  }
  func.func @transform_1(%arg0: i32) -> (i32, i32) {
    %c0_i32 = arith.constant 0 : i32
    %c0_i32_0 = arith.constant 0 : i32
    %c0_i32_1 = arith.constant 0 : i32
    return %c0_i32, %c0_i32_0 : i32, i32
  }
  func.func @transform_2(%arg0: i32) -> (i32, i32) {
    %c0_i32 = arith.constant 0 : i32
    %c0_i32_0 = arith.constant 0 : i32
    %c0_i32_1 = arith.constant 0 : i32
    return %c0_i32, %c0_i32_0 : i32, i32
  }
  func.func @transform_3(%arg0: i32) -> (i32, i32) {
    %c0_i32 = arith.constant 0 : i32
    %c0_i32_0 = arith.constant 0 : i32
    %c0_i32_1 = arith.constant 0 : i32
    return %c0_i32, %c0_i32_0 : i32, i32
  }
  func.func @transform_4(%arg0: i32) -> (i32, i32) {
    %c0_i32 = arith.constant 0 : i32
    %c0_i32_0 = arith.constant 0 : i32
    %c0_i32_1 = arith.constant 0 : i32
    return %c0_i32, %c0_i32_0 : i32, i32
  }
  func.func @transform_5(%arg0: i32) -> (i32, i32) {
    %c0_i32 = arith.constant 0 : i32
    %c0_i32_0 = arith.constant 0 : i32
    %c0_i32_1 = arith.constant 0 : i32
    return %c0_i32, %c0_i32_0 : i32, i32
  }
  func.func @transform_6(%arg0: i32) -> (i32, i32) {
    %c0_i32 = arith.constant 0 : i32
    %c0_i32_0 = arith.constant 0 : i32
    %c0_i32_1 = arith.constant 0 : i32
    return %c0_i32, %c0_i32_0 : i32, i32
  }
  func.func @transform_7(%arg0: i32) -> (i32, i32) {
    %c0_i32 = arith.constant 0 : i32
    %c0_i32_0 = arith.constant 0 : i32
    return %arg0, %c0_i32 : i32, i32
  }
}

</mosaic_0001>

<bundles_post_ra>
// kernel: tpu_custom_call.1
= control target key start
LH: loop header
LB: loop body
LE: loop exit
PB: predicated region body
PF: predicated region fallthrough
CT: control target
= control target key end

     0   :  { %12 = vsyncpa [#allocation3], 0  ;;  %s440_s0 = inlined_call_operand.hbm [shape: f32[8,128], index: 0, kind: input, shape index: {}]   ;;  %s441_s1 = inlined_call_operand.hbm [shape: f32[128,128], index: 1, kind: input, shape index: {}]   ;;  %s442_s2 = inlined_call_operand.vmem [shape: f32[1,128], index: 2, kind: input, shape index: {}]   ;;  %s443_s3 = inlined_call_operand.hbm [shape: f32[128,128], index: 3, kind: input, shape index: {}]   ;;  %s444_s4 = inlined_call_operand.vmem [shape: f32[1,128], index: 4, kind: input, shape index: {}]   ;;  %s445_s5 = inlined_call_operand.hbm [shape: f32[128,128], index: 5, kind: input, shape index: {}]   ;;  %s446_s6 = inlined_call_operand.vmem [shape: f32[1,128], index: 6, kind: input, shape index: {}]   ;;  %s447_s7 = inlined_call_operand.hbm [shape: f32[8,128], index: 7, kind: output, shape index: {}]  }
   0x1   :  { %13 = vsyncpa [#allocation6], 0 }
   0x2   :  { %14 = vsyncpa [#allocation9], 0  ;;  %s31_s26 = sshll.u32 %s441_s1, 4  ;;  %s32_s26 = int_to_ptr.hbm [resolvable:$true] %s31_s26 }
   0x3   :  { %15 = vsyncpa [#allocation4], 0  ;;  %s369_s27 = smov [#allocation5]   ;;  %s21_s8 = sshll.u32 %s440_s0, 4  ;;  %s22_s8 = int_to_ptr.hbm [resolvable:$true] %s21_s8 }
   0x4   :  { %s33_s28 = sshll.u32 %s369_s27, 4  ;;  %s370_s9 = smov 128   ;;  %s34_s28 = int_to_ptr.vmem [resolvable:$true] %s33_s28 }
   0x5   :  { %s371_s10 = smov 8   ;;  %s372_s11 = smov [#allocation2]  }
   0x6   :  { %39 = dma.hbm_to_vmem [thread:$0]  %s32_s26, 2048, %s34_s28, [#allocation6], %s370_s9, %s370_s9, %s371_s10  }
   0x7   :  { %s23_s12 = sshll.u32 %s372_s11, 4  ;;  %s46_s15 = sshll.u32 %s443_s3, 4  ;;  %s24_s12 = int_to_ptr.vmem [resolvable:$true] %s23_s12  ;;  %s47_s15 = int_to_ptr.hbm [resolvable:$true] %s46_s15 }
   0x8   :  { %26 = dma.hbm_to_vmem [thread:$0]  %s22_s8, 128, %s24_s12, [#allocation3]  }
   0x9   :  { %s61_s17 = sshll.u32 %s445_s5, 4  ;;  %s373_s18 = smov [#allocation7]   ;;  %s62_s17 = int_to_ptr.hbm [resolvable:$true] %s61_s17 }
   0xa   :  { %s48_s19 = sshll.u32 %s373_s18, 4  ;;  %s374_s0 = smov [#allocation8]   ;;  %s49_s19 = int_to_ptr.vmem [resolvable:$true] %s48_s19 }
   0xb   :  { %54 = dma.hbm_to_vmem [thread:$0]  %s47_s15, 2048, %s49_s19, [#allocation6], %s370_s9, %s370_s9, %s371_s10  }
   0xc   :  { %s63_s20 = sshll.u32 %s374_s0, 4  ;;  %s64_s20 = int_to_ptr.vmem [resolvable:$true] %s63_s20 }
   0xd   :  { %69 = dma.hbm_to_vmem [thread:$0]  %s62_s17, 2048, %s64_s20, [#allocation9], %s370_s9, %s370_s9, %s371_s10  }
   0xe   :  { %361 = dma.done.wait [#allocation3], 128  }
   0xf   :  { %362 = vsyncadd [#allocation3], 4294967168 }
  0x10   :  { %363 = dma.done.wait [#allocation6], 4096  }
  0x11   :  { %364 = vsyncadd [#allocation6], 4294963200 }
  0x12   :  { %365 = dma.done.wait [#allocation9], 2048  }
  0x13   :  { %366 = vsyncadd [#allocation9], 4294965248  ;;  %v104_v0 = vld [vmem:[#allocation5 + $0x78] sm:$0xff]  ;;  %v103_v1 = vld [vmem:[#allocation5 + $0x70] sm:$0xff]  ;;  %s375_s24 = smov [#allocation10]   ;;  %s219_s28 = sshll.u32 %s447_s7, 4  ;;  %s220_s28 = int_to_ptr.hbm [resolvable:$true] %s219_s28 }
  0x14   :  { %109 = vmatpush.msra.mxu0 %v104_v0  ;;  %v102_v2 = vld [vmem:[#allocation5 + $0x68] sm:$0xff]  ;;  %v101_v3 = vld [vmem:[#allocation5 + $0x60] sm:$0xff]  ;;  %v145_v4 = vld [vmem:[#allocation7 + $0x78] sm:$0xff]  ;;  %s217_s25 = sshll.u32 %s375_s24, 4  ;;  %s218_s25 = int_to_ptr.vmem [resolvable:$true] %s217_s25 }
  0x15   :  { %v100_v5 = vld [vmem:[#allocation5 + $0x58] sm:$0xff]  ;;  %150 = vmatpush.msra.mxu1 %v145_v4  ;;  %v144_v6 = vld [vmem:[#allocation7 + $0x70] sm:$0xff]  ;;  %v143_v7 = vld [vmem:[#allocation7 + $0x68] sm:$0xff] }
  0x16   :  { %110 = vmatpush.msra.mxu0 %v103_v1  ;;  %v99_v8 = vld [vmem:[#allocation5 + $0x50] sm:$0xff]  ;;  %v142_v9 = vld [vmem:[#allocation7 + $0x60] sm:$0xff]  ;;  %v98_v10 = vld [vmem:[#allocation5 + $0x48] sm:$0xff] }
  0x17   :  { %151 = vmatpush.msra.mxu1 %v144_v6  ;;  %v141_v11 = vld [vmem:[#allocation7 + $0x58] sm:$0xff]  ;;  %v97_v12 = vld [vmem:[#allocation5 + $0x40] sm:$0xff]  ;;  %v140_v13 = vld [vmem:[#allocation7 + $0x50] sm:$0xff] }
  0x18   :  { %111 = vmatpush.msra.mxu0 %v102_v2  ;;  %v96_v14 = vld [vmem:[#allocation5 + $0x38] sm:$0xff]  ;;  %v139_v15 = vld [vmem:[#allocation7 + $0x48] sm:$0xff]  ;;  %v95_v16 = vld [vmem:[#allocation5 + $0x30] sm:$0xff] }
  0x19   :  { %152 = vmatpush.msra.mxu1 %v143_v7  ;;  %v138_v17 = vld [vmem:[#allocation7 + $0x40] sm:$0xff]  ;;  %v94_v18 = vld [vmem:[#allocation5 + $0x28] sm:$0xff]  ;;  %v137_v19 = vld [vmem:[#allocation7 + $0x38] sm:$0xff] }
  0x1a   :  { %112 = vmatpush.msra.mxu0 %v101_v3  ;;  %v93_v20 = vld [vmem:[#allocation5 + $0x20] sm:$0xff]  ;;  %v136_v21 = vld [vmem:[#allocation7 + $0x30] sm:$0xff]  ;;  %v92_v22 = vld [vmem:[#allocation5 + $0x18] sm:$0xff] }
  0x1b   :  { %153 = vmatpush.msra.mxu1 %v142_v9  ;;  %v135_v23 = vld [vmem:[#allocation7 + $0x28] sm:$0xff]  ;;  %v91_v24 = vld [vmem:[#allocation5 + $0x10] sm:$0xff]  ;;  %v134_v25 = vld [vmem:[#allocation7 + $0x20] sm:$0xff] }
  0x1c   :  { %113 = vmatpush.msra.mxu0 %v100_v5  ;;  %v90_v26 = vld [vmem:[#allocation5 + $0x8] sm:$0xff]  ;;  %v133_v27 = vld [vmem:[#allocation7 + $0x18] sm:$0xff]  ;;  %v89_v28 = vld [vmem:[#allocation5] sm:$0xff] }
  0x1d   :  { %154 = vmatpush.msra.mxu1 %v141_v11  ;;  %v88_v29 = vld [vmem:[#allocation2] sm:$0xff]  ;;  %v132_v30 = vld [vmem:[#allocation7 + $0x10] sm:$0xff]  ;;  %v131_v31 = vld [vmem:[#allocation7 + $0x8] sm:$0xff] }
  0x1e   :  { %114 = vmatpush.msra.mxu0 %v99_v8  ;;  %v130_v32 = vld [vmem:[#allocation7] sm:$0xff]  ;;  %v186_v33 = vld [vmem:[#allocation8 + $0x78] sm:$0xff]  ;;  %v185_v34 = vld [vmem:[#allocation8 + $0x70] sm:$0xff] }
  0x1f   :  { %155 = vmatpush.msra.mxu1 %v140_v13  ;;  %191 = vmatpush.msra.mxu2 %v186_v33  ;;  %v184_v35 = vld [vmem:[#allocation8 + $0x68] sm:$0xff]  ;;  %v183_v36 = vld [vmem:[#allocation8 + $0x60] sm:$0xff]  ;;  %v182_v37 = vld [vmem:[#allocation8 + $0x58] sm:$0xff] }
  0x20   :  { %115 = vmatpush.msra.mxu0 %v98_v10  ;;  %v181_v38 = vld [vmem:[#allocation8 + $0x50] sm:$0xff]  ;;  %v180_v39 = vld [vmem:[#allocation8 + $0x48] sm:$0xff]  ;;  %v179_v40 = vld [vmem:[#allocation8 + $0x40] sm:$0xff] }
  0x21   :  { %156 = vmatpush.msra.mxu1 %v139_v15  ;;  %192 = vmatpush.msra.mxu2 %v185_v34  ;;  %v178_v41 = vld [vmem:[#allocation8 + $0x38] sm:$0xff]  ;;  %v177_v42 = vld [vmem:[#allocation8 + $0x30] sm:$0xff]  ;;  %v176_v43 = vld [vmem:[#allocation8 + $0x28] sm:$0xff] }
  0x22   :  { %116 = vmatpush.msra.mxu0 %v97_v12  ;;  %v175_v44 = vld [vmem:[#allocation8 + $0x20] sm:$0xff]  ;;  %v174_v45 = vld [vmem:[#allocation8 + $0x18] sm:$0xff]  ;;  %v173_v50 = vld [vmem:[#allocation8 + $0x10] sm:$0xff] }
  0x23   :  { %157 = vmatpush.msra.mxu1 %v138_v17  ;;  %193 = vmatpush.msra.mxu2 %v184_v35  ;;  %v238_v46 = vld [vmem:[%s442_s2] ss:$0 sm:$0xff]  ;;  %v172_v51 = vld [vmem:[#allocation8 + $0x8] sm:$0xff]  ;;  %v171_v52 = vld [vmem:[#allocation8] sm:$0xff] }
  0x24   :  { %117 = vmatpush.msra.mxu0 %v96_v14  ;;  %v239_v53 = vld [vmem:[%s444_s4] ss:$0 sm:$0xff] }
  0x25   :  { %158 = vmatpush.msra.mxu1 %v137_v19  ;;  %194 = vmatpush.msra.mxu2 %v183_v36  ;;  %v240_v57 = vld [vmem:[%s446_s6] ss:$0 sm:$0xff] }
  0x26   :  { %118 = vmatpush.msra.mxu0 %v95_v16 }
  0x27   :  { %159 = vmatpush.msra.mxu1 %v136_v21  ;;  %195 = vmatpush.msra.mxu2 %v182_v37 }
  0x28   :  { %119 = vmatpush.msra.mxu0 %v94_v18 }
  0x29   :  { %160 = vmatpush.msra.mxu1 %v135_v23  ;;  %196 = vmatpush.msra.mxu2 %v181_v38 }
  0x2a   :  { %120 = vmatpush.msra.mxu0 %v93_v20 }
  0x2b   :  { %161 = vmatpush.msra.mxu1 %v134_v25  ;;  %197 = vmatpush.msra.mxu2 %v180_v39 }
  0x2c   :  { %121 = vmatpush.msra.mxu0 %v92_v22 }
  0x2d   :  { %162 = vmatpush.msra.mxu1 %v133_v27  ;;  %198 = vmatpush.msra.mxu2 %v179_v40 }
  0x2e   :  { %122 = vmatpush.msra.mxu0 %v91_v24 }
  0x2f   :  { %163 = vmatpush.msra.mxu1 %v132_v30  ;;  %199 = vmatpush.msra.mxu2 %v178_v41 }
  0x30   :  { %123 = vmatpush.msra.mxu0 %v90_v26 }
  0x31   :  { %164 = vmatpush.msra.mxu1 %v131_v31  ;;  %200 = vmatpush.msra.mxu2 %v177_v42 }
  0x32   :  { %124 = vmatpush.msra.mxu0 %v89_v28 }
  0x33   :  { %125 = vmatmul.f32.vlgmr.msra.gmra.mxu0 %v88_v29  ;;  %165 = vmatpush.msra.mxu1 %v130_v32 }
  0x34   :  { %201 = vmatpush.msra.mxu2 %v176_v43 }
  0x36   :  { %202 = vmatpush.msra.mxu2 %v175_v44 }
  0x38   :  { %203 = vmatpush.msra.mxu2 %v174_v45 }
  0x3a   :  { %204 = vmatpush.msra.mxu2 %v173_v50 }
  0x3c   :  { %205 = vmatpush.msra.mxu2 %v172_v51 }
  0x3e   :  { %206 = vmatpush.msra.mxu2 %v171_v52 }
  0xb0   :  { %v126_v47 = vpop.f32.mrf.mxu0 }
  0xb1   :  { %v127_v48 = vadd.f32 %v238_v46, %v126_v47 }
  0xb3   :  { %v129_v49 = vmax.f32 %v127_v48, 0.0 }
  0xb5   :  { %166 = vmatmul.f32.vlgmr.msra.gmra.mxu1 %v129_v49 }
 0x132   :  { %v167_v54 = vpop.f32.mrf.mxu1 }
 0x133   :  { %v168_v55 = vadd.f32 %v239_v53, %v167_v54 }
 0x135   :  { %v170_v56 = vmax.f32 %v168_v55, 0.0 }
 0x137   :  { %207 = vmatmul.f32.vlgmr.msra.gmra.mxu2 %v170_v56 }
 0x1ba   :  { %v208_v58 = vpop.f32.mrf.mxu2 }
 0x1bb   :  { %v209_v59 = vadd.f32 %v240_v57, %v208_v58 }
 0x1bd   :  { %211 = vst [vmem:[#allocation10] sm:$0xff] %v209_v59 }
 0x1be   :  { %222 = dma.vmem_to_hbm [thread:$0]  %s218_s25, 128, %s220_s28, [#allocation4]  }
 0x1bf   :  { %367 = dma.done.wait [#allocation4], 128  }
 0x1c0   :  { %368 = vsyncadd [#allocation4], 4294967168 }
 0x1c1   :  { %227 = vsyncpa [#allocation3], 1 }
 0x1c2   :  { %228 = vsyncpa [#allocation6], 1 }
 0x1c3   :  { %229 = vsyncpa [#allocation9], 1 }
 0x1c4   :  { %230 = vsyncpa [#allocation4], 1 }

</bundles_post_ra>
